<compile_context>
chip_gen: v6e
topology: v6e:2x2x1
jax: 0.10.0
libtpu: 0.0.40
codegen_flags: <defaults>
</compile_context>

<pallas_src>
import math

import jax
import jax.numpy as jnp
from jax.experimental import pallas as pl
from jax.experimental.pallas import tpu as pltpu

EPS = 1e-5  # PyTorch BatchNorm1d default


def _embedder_bn_kernel(idx_ref, table_ref, gamma_ref, beta_ref, out_ref, emb_ref):
    # idx_ref   : (N,)      int32   SMEM
    # table_ref : (G, Dp)   f32     VMEM   (Dp = D padded to multiple of 128)
    # gamma_ref : (1, Dp)   f32     VMEM
    # beta_ref  : (1, Dp)   f32     VMEM
    # out_ref   : (N, Dp)   f32     VMEM
    # emb_ref   : (N, Dp)   f32     VMEM scratch (gathered embeddings)
    n = out_ref.shape[0]

    # Gather: N unrolled row reads; scalar unit computes the dynamic sublane
    # address from the SMEM index, vld does the rest. No one-hot, no MXU.
    for i in range(n):
        emb_ref[i:i + 1, :] = table_ref[pl.ds(idx_ref[i], 1), :]

    emb = emb_ref[...]                                           # (N, Dp)
    inv_n = 1.0 / n
    mean = jnp.sum(emb, axis=0, keepdims=True) * inv_n           # (1, Dp)
    centered = emb - mean
    var = jnp.sum(centered * centered, axis=0, keepdims=True) * inv_n
    inv_std = jax.lax.rsqrt(var + EPS)                           # (1, Dp)

    # Fold BN into one scale/shift -> (N, Dp) epilogue is 2 VPU ops.
    scale = inv_std * gamma_ref[...]                             # (1, Dp)
    shift = beta_ref[...] - mean * scale                         # (1, Dp)
    out_ref[...] = emb * scale + shift


def individual_embedder_forward(indices, embed_weight, gamma, beta):
    """indices: (N,) int; embed_weight: (G, D) f32; gamma/beta: (D,) f32."""
    n = indices.shape[0]
    g, d = embed_weight.shape
    d_pad = ((d + 127) // 128) * 128  # lane-dense last dim (multiple of 128)

    table = jnp.pad(embed_weight.astype(jnp.float32), ((0, 0), (0, d_pad - d)))
    gamma_p = jnp.pad(gamma.astype(jnp.float32), (0, d_pad - d)).reshape(1, d_pad)
    beta_p = jnp.pad(beta.astype(jnp.float32), (0, d_pad - d)).reshape(1, d_pad)
    idx = indices.astype(jnp.int32)

    smem = pl.BlockSpec(memory_space=pltpu.MemorySpace.SMEM)
    vmem = pl.BlockSpec(memory_space=pltpu.MemorySpace.VMEM)

    out_padded = pl.pallas_call(
        _embedder_bn_kernel,
        out_shape=jax.ShapeDtypeStruct((n, d_pad), jnp.float32),
        in_specs=[smem, vmem, vmem, vmem],
        out_specs=vmem,
        scratch_shapes=[pltpu.VMEM((n, d_pad), jnp.float32)],
    )(idx, table, gamma_p, beta_p)

    # Strip the lane padding outside the kernel.
    return out_padded[:, :d]


def _reference(indices, embed_weight, gamma, beta):
    emb = embed_weight[indices]
    mean = emb.mean(axis=0, keepdims=True)
    var = ((emb - mean) ** 2).mean(axis=0, keepdims=True)
    return (emb - mean) / jnp.sqrt(var + EPS) * gamma[None, :] + beta[None, :]


if __name__ == "__main__":
    # Small shapes consistent with the module.
    n_GO_classes = 16       # num_embeddings
    latent_dim = 32         # embedding_dim / BatchNorm1d features
    batch = 8               # number of indices

    key = jax.random.PRNGKey(0)
    k_embed, k_idx = jax.random.split(key)

    # Deterministic parameter init matching the module's __init__:
    #   embed.weight ~ U(-k, k), k = sqrt(1/latent_dim)
    #   BatchNorm1d: gamma = 1, beta = 0
    k = math.sqrt(1.0 / latent_dim)
    embed_weight = jax.random.uniform(
        k_embed, (n_GO_classes, latent_dim), jnp.float32, minval=-k, maxval=k)
    gamma = jnp.ones((latent_dim,), jnp.float32)
    beta = jnp.zeros((latent_dim,), jnp.float32)

    indices = jax.random.randint(k_idx, (batch,), 0, n_GO_classes, jnp.int32)

    out = individual_embedder_forward(indices, embed_weight, gamma, beta)
    out = jax.block_until_ready(out)

    ref = _reference(indices, embed_weight, gamma, beta)
    assert out.shape == (batch, latent_dim)
    assert jnp.allclose(out, ref, atol=1e-4, rtol=1e-4)

    print("KERNEL_OK")
</pallas_src>

<mosaic_0001>
module attributes {stable_mosaic.version = 11 : i64} {
  func.func @_embedder_bn_kernel(%arg0: memref<8xi32, #tpu.memory_space<smem>>, %arg1: memref<16x128xf32, #tpu.memory_space<vmem>>, %arg2: memref<1x128xf32, #tpu.memory_space<vmem>>, %arg3: memref<1x128xf32, #tpu.memory_space<vmem>>, %arg4: memref<8x128xf32, #tpu.memory_space<vmem>>, %arg5: memref<8x128xf32, #tpu.memory_space<vmem>>) attributes {dimension_semantics = [], scalar_prefetch = 0 : i64, scratch_operands = 1 : i64, tpu.core_type = #tpu.core_type<tc>} {
    %c0 = arith.constant 0 : index
    %0 = memref.load %arg0[%c0] : memref<8xi32, #tpu.memory_space<smem>>
    %1 = arith.index_cast %0 : i32 to index
    %c0_0 = arith.constant 0 : index
    %2 = vector.load %arg1[%1, %c0_0] : memref<16x128xf32, #tpu.memory_space<vmem>>, vector<1x128xf32>
    %c0_1 = arith.constant 0 : index
    %c0_2 = arith.constant 0 : index
    %3 = vector.load %arg5[%c0_1, %c0_2] : memref<8x128xf32, #tpu.memory_space<vmem>>, vector<1x128xf32>
    tpu.vector_store %arg5[%c0_1, %c0_2], %2 {strides = array<i32>} : memref<8x128xf32, #tpu.memory_space<vmem>>, vector<1x128xf32>,
    %c1 = arith.constant 1 : index
    %4 = memref.load %arg0[%c1] : memref<8xi32, #tpu.memory_space<smem>>
    %5 = arith.index_cast %4 : i32 to index
    %c0_3 = arith.constant 0 : index
    %6 = vector.load %arg1[%5, %c0_3] : memref<16x128xf32, #tpu.memory_space<vmem>>, vector<1x128xf32>
    %c1_4 = arith.constant 1 : index
    %c0_5 = arith.constant 0 : index
    %7 = vector.load %arg5[%c1_4, %c0_5] : memref<8x128xf32, #tpu.memory_space<vmem>>, vector<1x128xf32>
    tpu.vector_store %arg5[%c1_4, %c0_5], %6 {strides = array<i32>} : memref<8x128xf32, #tpu.memory_space<vmem>>, vector<1x128xf32>,
    %c2 = arith.constant 2 : index
    %8 = memref.load %arg0[%c2] : memref<8xi32, #tpu.memory_space<smem>>
    %9 = arith.index_cast %8 : i32 to index
    %c0_6 = arith.constant 0 : index
    %10 = vector.load %arg1[%9, %c0_6] : memref<16x128xf32, #tpu.memory_space<vmem>>, vector<1x128xf32>
    %c2_7 = arith.constant 2 : index
    %c0_8 = arith.constant 0 : index
    %11 = vector.load %arg5[%c2_7, %c0_8] : memref<8x128xf32, #tpu.memory_space<vmem>>, vector<1x128xf32>
    tpu.vector_store %arg5[%c2_7, %c0_8], %10 {strides = array<i32>} : memref<8x128xf32, #tpu.memory_space<vmem>>, vector<1x128xf32>,
    %c3 = arith.constant 3 : index
    %12 = memref.load %arg0[%c3] : memref<8xi32, #tpu.memory_space<smem>>
    %13 = arith.index_cast %12 : i32 to index
    %c0_9 = arith.constant 0 : index
    %14 = vector.load %arg1[%13, %c0_9] : memref<16x128xf32, #tpu.memory_space<vmem>>, vector<1x128xf32>
    %c3_10 = arith.constant 3 : index
    %c0_11 = arith.constant 0 : index
    %15 = vector.load %arg5[%c3_10, %c0_11] : memref<8x128xf32, #tpu.memory_space<vmem>>, vector<1x128xf32>
    tpu.vector_store %arg5[%c3_10, %c0_11], %14 {strides = array<i32>} : memref<8x128xf32, #tpu.memory_space<vmem>>, vector<1x128xf32>,
    %c4 = arith.constant 4 : index
    %16 = memref.load %arg0[%c4] : memref<8xi32, #tpu.memory_space<smem>>
    %17 = arith.index_cast %16 : i32 to index
    %c0_12 = arith.constant 0 : index
    %18 = vector.load %arg1[%17, %c0_12] : memref<16x128xf32, #tpu.memory_space<vmem>>, vector<1x128xf32>
    %c4_13 = arith.constant 4 : index
    %c0_14 = arith.constant 0 : index
    %19 = vector.load %arg5[%c4_13, %c0_14] : memref<8x128xf32, #tpu.memory_space<vmem>>, vector<1x128xf32>
    tpu.vector_store %arg5[%c4_13, %c0_14], %18 {strides = array<i32>} : memref<8x128xf32, #tpu.memory_space<vmem>>, vector<1x128xf32>,
    %c5 = arith.constant 5 : index
    %20 = memref.load %arg0[%c5] : memref<8xi32, #tpu.memory_space<smem>>
    %21 = arith.index_cast %20 : i32 to index
    %c0_15 = arith.constant 0 : index
    %22 = vector.load %arg1[%21, %c0_15] : memref<16x128xf32, #tpu.memory_space<vmem>>, vector<1x128xf32>
    %c5_16 = arith.constant 5 : index
    %c0_17 = arith.constant 0 : index
    %23 = vector.load %arg5[%c5_16, %c0_17] : memref<8x128xf32, #tpu.memory_space<vmem>>, vector<1x128xf32>
    tpu.vector_store %arg5[%c5_16, %c0_17], %22 {strides = array<i32>} : memref<8x128xf32, #tpu.memory_space<vmem>>, vector<1x128xf32>,
    %c6 = arith.constant 6 : index
    %24 = memref.load %arg0[%c6] : memref<8xi32, #tpu.memory_space<smem>>
    %25 = arith.index_cast %24 : i32 to index
    %c0_18 = arith.constant 0 : index
    %26 = vector.load %arg1[%25, %c0_18] : memref<16x128xf32, #tpu.memory_space<vmem>>, vector<1x128xf32>
    %c6_19 = arith.constant 6 : index
    %c0_20 = arith.constant 0 : index
    %27 = vector.load %arg5[%c6_19, %c0_20] : memref<8x128xf32, #tpu.memory_space<vmem>>, vector<1x128xf32>
    tpu.vector_store %arg5[%c6_19, %c0_20], %26 {strides = array<i32>} : memref<8x128xf32, #tpu.memory_space<vmem>>, vector<1x128xf32>,
    %c7 = arith.constant 7 : index
    %28 = memref.load %arg0[%c7] : memref<8xi32, #tpu.memory_space<smem>>
    %29 = arith.index_cast %28 : i32 to index
    %c0_21 = arith.constant 0 : index
    %30 = vector.load %arg1[%29, %c0_21] : memref<16x128xf32, #tpu.memory_space<vmem>>, vector<1x128xf32>
    %c7_22 = arith.constant 7 : index
    %c0_23 = arith.constant 0 : index
    %31 = vector.load %arg5[%c7_22, %c0_23] : memref<8x128xf32, #tpu.memory_space<vmem>>, vector<1x128xf32>
    tpu.vector_store %arg5[%c7_22, %c0_23], %30 {strides = array<i32>} : memref<8x128xf32, #tpu.memory_space<vmem>>, vector<1x128xf32>,
    %c0_24 = arith.constant 0 : index
    %c0_25 = arith.constant 0 : index
    %32 = vector.load %arg5[%c0_24, %c0_25] : memref<8x128xf32, #tpu.memory_space<vmem>>, vector<8x128xf32>
    %cst = arith.constant dense<0.000000e+00> : vector<128xf32>
    %33 = vector.multi_reduction <add>, %32, %cst [0] : vector<8x128xf32> to vector<128xf32>
    %34 = vector.shape_cast %33 : vector<128xf32> to vector<1x128xf32>
    %cst_26 = arith.constant 1.250000e-01 : f32
    %35 = vector.broadcast %cst_26 : f32 to vector<1x128xf32>
    %36 = arith.mulf %34, %35 : vector<1x128xf32>
    %37 = vector.broadcast %36 : vector<1x128xf32> to vector<8x128xf32>
    %38 = arith.subf %32, %37 : vector<8x128xf32>
    %39 = arith.mulf %38, %38 : vector<8x128xf32>
    %cst_27 = arith.constant dense<0.000000e+00> : vector<128xf32>
    %40 = vector.multi_reduction <add>, %39, %cst_27 [0] : vector<8x128xf32> to vector<128xf32>
    %41 = vector.shape_cast %40 : vector<128xf32> to vector<1x128xf32>
    %cst_28 = arith.constant 1.250000e-01 : f32
    %42 = vector.broadcast %cst_28 : f32 to vector<1x128xf32>
    %43 = arith.mulf %41, %42 : vector<1x128xf32>
    %cst_29 = arith.constant 9.99999974E-6 : f32
    %44 = vector.broadcast %cst_29 : f32 to vector<1x128xf32>
    %45 = arith.addf %43, %44 : vector<1x128xf32>
    %46 = math.rsqrt %45 : vector<1x128xf32>
    %c0_30 = arith.constant 0 : index
    %c0_31 = arith.constant 0 : index
    %47 = vector.load %arg2[%c0_30, %c0_31] : memref<1x128xf32, #tpu.memory_space<vmem>>, vector<1x128xf32>
    %48 = arith.mulf %46, %47 : vector<1x128xf32>
    %c0_32 = arith.constant 0 : index
    %c0_33 = arith.constant 0 : index
    %49 = vector.load %arg3[%c0_32, %c0_33] : memref<1x128xf32, #tpu.memory_space<vmem>>, vector<1x128xf32>
    %50 = arith.mulf %36, %48 : vector<1x128xf32>
    %51 = arith.subf %49, %50 : vector<1x128xf32>
    %52 = vector.broadcast %48 : vector<1x128xf32> to vector<8x128xf32>
    %53 = arith.mulf %32, %52 : vector<8x128xf32>
    %54 = vector.broadcast %51 : vector<1x128xf32> to vector<8x128xf32>
    %55 = arith.addf %53, %54 : vector<8x128xf32>
    %c0_34 = arith.constant 0 : index
    %c0_35 = arith.constant 0 : index
    %56 = vector.load %arg4[%c0_34, %c0_35] : memref<8x128xf32, #tpu.memory_space<vmem>>, vector<8x128xf32>
    tpu.vector_store %arg4[%c0_34, %c0_35], %55 {strides = array<i32>} : memref<8x128xf32, #tpu.memory_space<vmem>>, vector<8x128xf32>,
    return
  }
}

</mosaic_0001>

<bundles_post_ra>
// kernel: tpu_custom_call.1
= control target key start
LH: loop header
LB: loop body
LE: loop exit
PB: predicated region body
PF: predicated region fallthrough
CT: control target
= control target key end

     0   :  { %9 = vsyncpa [#allocation6], 0  ;;  %s249_s0 = inlined_call_operand.hbm [shape: s32[8], index: 0, kind: input, shape index: {}]   ;;  %s250_s1 = inlined_call_operand.hbm [shape: f32[16,128], index: 1, kind: input, shape index: {}]   ;;  %s251_s2 = inlined_call_operand.vmem [shape: f32[1,128], index: 2, kind: input, shape index: {}]   ;;  %s252_s3 = inlined_call_operand.vmem [shape: f32[1,128], index: 3, kind: input, shape index: {}]   ;;  %s253_s4 = inlined_call_operand.hbm [shape: f32[8,128], index: 4, kind: output, shape index: {}]  }
   0x1   :  { %10 = vsyncpa [#allocation4], 0 }
   0x2   :  { %11 = vsyncpa [#allocation5], 0  ;;  %s204_s15 = smov [#allocation3]   ;;  %s205_s18 = smov [#allocation7]  }
   0x3   :  { %19 = dma.hbm_to_smem %s249_s0, 16, %s204_s15, [#allocation6]  }
   0x4   :  { %s25_s19 = sshll.u32 %s205_s18, 4  ;;  %s26_s19 = int_to_ptr.vmem [resolvable:$true] %s25_s19 }
   0x5   :  { %s166_s20 = scalar_lea.vmem %s26_s19, 256  ;;  %p171_p1 = scmp.lt.s32.totalorder %s26_s19, %s26_s19 }
   0x6   :  { %p167_p0 = scmp.ne.s32.totalorder %s26_s19, %s166_s20  ;;  %p172_p2 = scmp.lt.s32.totalorder %s166_s20, %s166_s20 }
   0x8   :  { %p173_p3 = por %p172_p2, %p171_p1 }
   0xa   :  { %p174_p4 = pnand %p173_p3, %p167_p0 }
   0xc   :  { %177 = shalt.err (!%p174_p4)
}
   0xd   :  { %s206_s21 = smov 128   ;;  %s207_s22 = smov 8  }
   0xe   :  { %31 = dma.hbm_to_vmem [thread:$0]  %s250_s1, 256, %s26_s19, [#allocation4], %s206_s21, %s206_s21, %s207_s22  }
   0xf   :  { %198 = dma.done.wait [#allocation6], 16  }
  0x10   :  { %199 = vsyncadd [#allocation6], 4294967280 }
  0x11   :  { %200 = dma.done.wait [#allocation4], 256  }
  0x12   :  { %201 = vsyncadd [#allocation4], 4294967040 }
  0x13   :  { %42 = sfence }
  0x14   :  { %s43_s0 = sld [smem:[#allocation3]]  ;;  %v99_v26 = vlaneseq  ;;  %v94_v28 = vld [vmem:[%s251_s2] sm:$0x1]  ;;  %s208_s17 = smov [#allocation8]  }
  0x15   :  { %s136_s25 = sld [smem:[#allocation3 + $0x1]]  ;;  %v96_v32 = vld [vmem:[%s252_s3] sm:$0x1]  ;;  %s118_s18 = sshll.u32 %s208_s17, 4  ;;  %s119_s18 = int_to_ptr.vmem [resolvable:$true] %s118_s18 }
  0x16   :  { %s137_s26 = sld [smem:[#allocation3 + $0x2]]  ;;  %v100_v27 = vshrl.u32 %v99_v26, 7  ;;  %s178_s19 = scalar_lea.vmem %s119_s18, 128 }
  0x17   :  { %s138_s27 = sld [smem:[#allocation3 + $0x3]]  ;;  %p179_p5 = scmp.ne.s32.totalorder %s119_s18, %s178_s19 }
  0x18   :  { %s139_s28 = sld [smem:[#allocation3 + $0x4]]  ;;  %v101_v29 = vsub.s32 0, %v100_v27  ;;  %p183_p6 = scmp.lt.s32.totalorder %s119_s18, %s119_s18 }
  0x19   :  { %s140_s29 = sld [smem:[#allocation3 + $0x5]]  ;;  %p184_p7 = scmp.lt.s32.totalorder %s178_s19, %s178_s19 }
  0x1a   :  { %s141_s30 = sld [smem:[#allocation3 + $0x6]]  ;;  %s44_s5 = scalar_lea.vmem [#allocation7], %s43_s0 }
  0x1b   :  { %v45_v0 = vld [vmem:[%s44_s5] sm:$0x1]  ;;  %s142_s6 = sld [smem:[#allocation3 + $0x7]]  ;;  %s48_s7 = scalar_lea.vmem [#allocation7], %s136_s25 }
  0x1c   :  { %46 = vst [vmem:[#allocation2] sm:$0x1] %v45_v0  ;;  %v49_v1 = vld [vmem:[%s48_s7] sm:$0x1]  ;;  %s52_s1 = scalar_lea.vmem [#allocation7], %s137_s26  ;;  %p185_p8 = por %p184_p7, %p183_p6 }
  0x1d   :  { %50 = vst [vmem:[#allocation2 + $0x1] sm:$0x1] %v49_v1  ;;  %v53_v2 = vld [vmem:[%s52_s1] sm:$0x1]  ;;  %s56_s8 = scalar_lea.vmem [#allocation7], %s138_s27 }
  0x1e   :  { %54 = vst [vmem:[#allocation2 + $0x2] sm:$0x1] %v53_v2  ;;  %v57_v3 = vld [vmem:[%s56_s8] sm:$0x1]  ;;  %s60_s9 = scalar_lea.vmem [#allocation7], %s139_s28  ;;  %p186_p9 = pnand %p185_p8, %p179_p5 }
  0x1f   :  { %58 = vst [vmem:[#allocation2 + $0x3] sm:$0x1] %v57_v3  ;;  %v61_v4 = vld [vmem:[%s60_s9] sm:$0x1]  ;;  %s64_s10 = scalar_lea.vmem [#allocation7], %s140_s29 }
  0x20   :  { %62 = vst [vmem:[#allocation2 + $0x4] sm:$0x1] %v61_v4  ;;  %v65_v5 = vld [vmem:[%s64_s10] sm:$0x1]  ;;  %s68_s11 = scalar_lea.vmem [#allocation7], %s141_s30 }
  0x21   :  { %66 = vst [vmem:[#allocation2 + $0x5] sm:$0x1] %v65_v5  ;;  %v69_v6 = vld [vmem:[%s68_s11] sm:$0x1]  ;;  %s72_s12 = scalar_lea.vmem [#allocation7], %s142_s6 }
  0x22   :  { %70 = vst [vmem:[#allocation2 + $0x6] sm:$0x1] %v69_v6  ;;  %v73_v7 = vld [vmem:[%s72_s12] sm:$0x1] }
  0x23   :  { %74 = vst [vmem:[#allocation2 + $0x7] sm:$0x1] %v73_v7 }
  0x2a   :  { %v75_v8 = vld [vmem:[#allocation2] sm:$0xff] }
  0x2b   :  { %v76_v9 = vrot.slane %v75_v8, 4 }
  0x2d   :  { %v77_v10 = vadd.f32 %v76_v9, %v75_v8 }
  0x2f   :  { %v78_v11 = vrot.slane %v77_v10, 2 }
  0x31   :  { %v79_v12 = vadd.f32 %v78_v11, %v77_v10 }
  0x33   :  { %v80_v13 = vrot.slane %v79_v12, 1 }
  0x35   :  { %v81_v14 = vadd.f32 %v80_v13, %v79_v12 }
  0x37   :  { %v82_v15 = vmul.f32 0.125, %v81_v14 }
  0x39   :  { %v83_v16 = vsub.f32 %v75_v8, %v82_v15 }
  0x3b   :  { %v84_v17 = vmul.f32 %v83_v16, %v83_v16 }
  0x3d   :  { %v85_v18 = vrot.slane %v84_v17, 4 }
  0x3f   :  { %v86_v19 = vadd.f32 %v85_v18, %v84_v17 }
  0x41   :  { %v87_v20 = vrot.slane %v86_v19, 2 }
  0x43   :  { %v88_v21 = vadd.f32 %v87_v20, %v86_v19 }
  0x45   :  { %v89_v22 = vrot.slane %v88_v21, 1 }
  0x47   :  { %v90_v23 = vadd.f32 %v89_v22, %v88_v21 }
  0x49   :  { %v91_v24 = vmul.f32 0.125, %v90_v23 }
  0x4b   :  { %v92_v25 = vadd.f32 1e-05, %v91_v24 }
  0x4d   :  { %148 = vrsqrt.f32 %v92_v25 }
  0x5a   :  { %v149_v30 = vpop.eup %148 }
  0x5b   :  { %v95_v31 = vmul.f32 %v149_v30, %v94_v28 }
  0x5d   :  { %v97_v33 = vmul.f32 %v95_v31, %v82_v15  ;;  %v102_v34 = vrot.slane %v95_v31, %v101_v29 }
  0x5f   :  { %v98_v35 = vsub.f32 %v96_v32, %v97_v33  ;;  %v103_v36 = vmul.f32 %v102_v34, %v75_v8 }
  0x61   :  { %v108_v37 = vrot.slane %v98_v35, %v101_v29 }
  0x63   :  { %v110_v38 = vadd.f32 %v108_v37, %v103_v36 }
  0x65   :  { %111 = vst [vmem:[#allocation8] sm:$0xff] %v110_v38 }
  0x66   :  { %189 = shalt.err (!%p186_p9)
}
  0x67   :  { %121 = dma.vmem_to_hbm [thread:$0]  %s119_s18, 128, %s253_s4, [#allocation5]  }
  0x68   :  { %202 = dma.done.wait [#allocation5], 128  }
  0x69   :  { %203 = vsyncadd [#allocation5], 4294967168 }
  0x6a   :  { %125 = vsyncpa [#allocation4], 1 }
  0x6b   :  { %126 = vsyncpa [#allocation5], 1 }
  0x6c   :  { %127 = vsyncpa [#allocation6], 1 }

</bundles_post_ra>
